<compile_context>
chip_gen: v7x
topology: tpu7x:2x2x1
jax: 0.10.0
libtpu: 0.0.40
codegen_flags: <defaults>
</compile_context>

<pallas_src>
import functools
import math

import jax
import jax.numpy as jnp
from jax.experimental import pallas as pl
from jax.experimental.pallas import tpu as pltpu

EPS = 1e-5  # PyTorch nn.LayerNorm default


def _encoder_kernel(B, L, D, H, dh,
                    x_ref, wqkv_ref, bqkv_ref, mask_ref, wo_ref, bo_ref,
                    ln1_w_ref, ln1_b_ref, wl_ref, bl_ref, ln2_w_ref, ln2_b_ref,
                    o_ref):
    # x_ref / o_ref are the flattened (B*L, D) activations (single grid step).
    x = x_ref[...]
    inv_scale = 1.0 / math.sqrt(dh)
    inv_n = 1.0 / (L * D)

    # ---- fused Q/K/V projection: one MXU launch for the whole batch --------
    qkv = jnp.dot(x, wqkv_ref[...], preferred_element_type=jnp.float32) \
        + bqkv_ref[...]                                   # (B*L, 3D)

    # ---- stack (batch, head)-major on the sublane axis ---------------------
    # Each slice is a static lane/sublane window; result is (B*H*L, dh).
    q_parts, k_parts, v_parts = [], [], []
    for b in range(B):
        r0, r1 = b * L, (b + 1) * L
        for h in range(H):
            c0, c1 = h * dh, (h + 1) * dh
            q_parts.append(qkv[r0:r1, c0:c1])
            k_parts.append(qkv[r0:r1, D + c0:D + c1])
            v_parts.append(qkv[r0:r1, 2 * D + c0:2 * D + c1])
    qs = jnp.concatenate(q_parts, axis=0)                 # (B*H*L, dh)
    ks = jnp.concatenate(k_parts, axis=0)
    vs = jnp.concatenate(v_parts, axis=0)

    # ---- one score matmul + block-diag mask + softmax + one ctx matmul -----
    s = jnp.dot(qs, ks.T, preferred_element_type=jnp.float32) * inv_scale
    s = s + mask_ref[...]                                 # 0 / -1e9 additive mask
    s = s - jnp.max(s, axis=-1, keepdims=True)
    p = jnp.exp(s)
    # exact normalization (approx EUP reciprocal would loosen 1e-4 parity)
    p = p * (1.0 / jnp.sum(p, axis=-1, keepdims=True))
    ctx_s = jnp.dot(p, vs, preferred_element_type=jnp.float32)   # (B*H*L, dh)

    # ---- un-stack back to (B*L, D): lane-concat heads, sublane-concat batch -
    ctx_rows = []
    for b in range(B):
        heads = [ctx_s[(b * H + h) * L:(b * H + h + 1) * L, :] for h in range(H)]
        ctx_rows.append(jnp.concatenate(heads, axis=1))   # (L, D)
    ctx = jnp.concatenate(ctx_rows, axis=0)               # (B*L, D)

    # ---- fused output projection (single matmul) ---------------------------
    attn = jnp.dot(ctx, wo_ref[...], preferred_element_type=jnp.float32) \
         + bo_ref[...]

    # dropout (eval mode) == identity
    res1 = attn + x

    # ---- LayerNorm over each batch's (L, D) block, one-pass stats ----------
    ln1_w = ln1_w_ref[...]
    ln1_b = ln1_b_ref[...]
    n1_rows = []
    for b in range(B):
        r = res1[b * L:(b + 1) * L, :]
        mu = jnp.sum(r) * inv_n
        var = jnp.sum(r * r) * inv_n - mu * mu
        n1_rows.append((r - mu) * jax.lax.rsqrt(var + EPS) * ln1_w + ln1_b)
    n1 = jnp.concatenate(n1_rows, axis=0)                 # (B*L, D)

    # ---- FFN linear (batched over all B*L rows) + residual + LayerNorm -----
    lin = jnp.dot(n1, wl_ref[...], preferred_element_type=jnp.float32) \
        + bl_ref[...]
    res2 = lin + n1

    ln2_w = ln2_w_ref[...]
    ln2_b = ln2_b_ref[...]
    out_rows = []
    for b in range(B):
        r = res2[b * L:(b + 1) * L, :]
        mu = jnp.sum(r) * inv_n
        var = jnp.sum(r * r) * inv_n - mu * mu
        out_rows.append((r - mu) * jax.lax.rsqrt(var + EPS) * ln2_w + ln2_b)
    o_ref[...] = jnp.concatenate(out_rows, axis=0).astype(o_ref.dtype)


def transformer_encoder(x, params, n_heads):
    (wq_t, bq, wk_t, bk, wv_t, bv, wo_t, bo,
     ln1_w, ln1_b, wl_t, bl, ln2_w, ln2_b) = params
    B, L, D = x.shape
    H = n_heads
    dh = D // H
    G = B * H

    # Host-side (free) fusions / constants.
    wqkv = jnp.concatenate([wq_t, wk_t, wv_t], axis=1)        # (D, 3D)
    bqkv = jnp.concatenate([bq, bk, bv], axis=1)              # (1, 3D)
    grp = jnp.arange(G * L, dtype=jnp.int32) // L
    mask = jnp.where(grp[:, None] == grp[None, :], 0.0, -1e9).astype(jnp.float32)

    x2 = x.reshape(B * L, D)                                   # free relayout

    operands = (x2, wqkv, bqkv, mask, wo_t, bo,
                ln1_w, ln1_b, wl_t, bl, ln2_w, ln2_b)

    def full(a):
        return pl.BlockSpec(a.shape, lambda i, _nd=a.ndim: (0,) * _nd)

    kernel = functools.partial(_encoder_kernel, B, L, D, H, dh)

    out2 = pl.pallas_call(
        kernel,
        out_shape=jax.ShapeDtypeStruct((B * L, D), x.dtype),
        grid_spec=pltpu.PrefetchScalarGridSpec(
            num_scalar_prefetch=0,
            grid=(1,),                      # single step: B folded into sublanes
            in_specs=[full(a) for a in operands],
            out_specs=pl.BlockSpec((B * L, D), lambda i: (0, 0)),
        ),
        compiler_params=pltpu.CompilerParams(
            dimension_semantics=("arbitrary",),
            vmem_limit_bytes=32 * 1024 * 1024,
        ),
    )(*operands)
    return out2.reshape(B, L, D)


def make_params(key, max_len, d_model, n_heads):
    """Deterministic synthetic parameters (Linear weights pre-transposed to (in, out))."""
    d_head = d_model // n_heads
    keys = jax.random.split(key, 16)
    kiter = iter(keys)

    def lin_t(k, in_dim, out_dim):
        bound = 1.0 / math.sqrt(in_dim)
        kw, kb = jax.random.split(k)
        w = jax.random.uniform(kw, (out_dim, in_dim), jnp.float32, -bound, bound)
        b = jax.random.uniform(kb, (1, out_dim), jnp.float32, -bound, bound)
        return w.T, b  # (in, out), (1, out)

    # Per-head q/k/v linears, stacked along the output dim -> (d_model, d_model)
    def stacked_heads(k):
        ks = jax.random.split(k, n_heads)
        wts, bs = zip(*(lin_t(ks[h], d_model, d_head) for h in range(n_heads)))
        return jnp.concatenate(wts, axis=1), jnp.concatenate(bs, axis=1)

    wq_t, bq = stacked_heads(next(kiter))
    wk_t, bk = stacked_heads(next(kiter))
    wv_t, bv = stacked_heads(next(kiter))
    wo_t, bo = lin_t(next(kiter), d_model, d_model)
    wl_t, bl = lin_t(next(kiter), d_model, d_model)

    # LayerNorm affine params over (max_len, d_model); perturbed from identity so
    # the test actually exercises the affine part deterministically.
    ln1_w = jnp.ones((max_len, d_model), jnp.float32) + 0.01 * jax.random.normal(
        next(kiter), (max_len, d_model), jnp.float32)
    ln1_b = 0.01 * jax.random.normal(next(kiter), (max_len, d_model), jnp.float32)
    ln2_w = jnp.ones((max_len, d_model), jnp.float32) + 0.01 * jax.random.normal(
        next(kiter), (max_len, d_model), jnp.float32)
    ln2_b = 0.01 * jax.random.normal(next(kiter), (max_len, d_model), jnp.float32)

    return (wq_t, bq, wk_t, bk, wv_t, bv, wo_t, bo,
            ln1_w, ln1_b, wl_t, bl, ln2_w, ln2_b)


def reference_forward(x, params, n_heads):
    """Pure-JAX reference mirroring the PyTorch module (eval mode)."""
    (wq_t, bq, wk_t, bk, wv_t, bv, wo_t, bo,
     ln1_w, ln1_b, wl_t, bl, ln2_w, ln2_b) = params
    B, L, D = x.shape
    dh = D // n_heads
    q = x @ wq_t + bq
    k = x @ wk_t + bk
    v = x @ wv_t + bv
    outs = []
    for h in range(n_heads):
        qh, kh, vh = (t[..., h * dh:(h + 1) * dh] for t in (q, k, v))
        s = jnp.einsum("bld,bmd->blm", qh, kh) / math.sqrt(dh)
        a = jax.nn.softmax(s, axis=-1)
        outs.append(jnp.einsum("blm,bmd->bld", a, vh))
    attn = jnp.concatenate(outs, axis=-1) @ wo_t + bo
    res1 = attn + x
    mu = jnp.mean(res1, axis=(1, 2), keepdims=True)
    var = jnp.var(res1, axis=(1, 2), keepdims=True)
    n1 = (res1 - mu) / jnp.sqrt(var + EPS) * ln1_w + ln1_b
    lin = n1 @ wl_t + bl
    res2 = lin + n1
    mu2 = jnp.mean(res2, axis=(1, 2), keepdims=True)
    var2 = jnp.var(res2, axis=(1, 2), keepdims=True)
    return (res2 - mu2) / jnp.sqrt(var2 + EPS) * ln2_w + ln2_b


if __name__ == "__main__":
    B, L, D, H = 2, 8, 32, 4   # batch, max_len, d_model, n_heads

    key = jax.random.PRNGKey(0)
    kx, kp = jax.random.split(key)
    x = jax.random.normal(kx, (B, L, D), jnp.float32)
    params = make_params(kp, L, D, H)

    out = transformer_encoder(x, params, H)
    out = jax.block_until_ready(out)

    ref = reference_forward(x, params, H)
    assert out.shape == (B, L, D)
    assert jnp.allclose(out, ref, atol=1e-4, rtol=1e-4), "mismatch vs JAX reference"

    print("KERNEL_OK")
</pallas_src>

<mosaic_0001>
module attributes {stable_mosaic.version = 11 : i64} {
  func.func @_encoder_kernel(%arg0: i32, %arg1: memref<16x32xf32, #tpu.memory_space<vmem>>, %arg2: memref<32x96xf32, #tpu.memory_space<vmem>>, %arg3: memref<1x96xf32, #tpu.memory_space<vmem>>, %arg4: memref<64x64xf32, #tpu.memory_space<vmem>>, %arg5: memref<32x32xf32, #tpu.memory_space<vmem>>, %arg6: memref<1x32xf32, #tpu.memory_space<vmem>>, %arg7: memref<8x32xf32, #tpu.memory_space<vmem>>, %arg8: memref<8x32xf32, #tpu.memory_space<vmem>>, %arg9: memref<32x32xf32, #tpu.memory_space<vmem>>, %arg10: memref<1x32xf32, #tpu.memory_space<vmem>>, %arg11: memref<8x32xf32, #tpu.memory_space<vmem>>, %arg12: memref<8x32xf32, #tpu.memory_space<vmem>>, %arg13: memref<16x32xf32, #tpu.memory_space<vmem>>) attributes {dimension_semantics = [#tpu.dimension_semantics<arbitrary>], iteration_bounds = array<i64: 1>, scalar_prefetch = 0 : i64, scratch_operands = 0 : i64, tpu.core_type = #tpu.core_type<tc>, window_params = [{pipeline_mode = #tpu.pipeline_mode<synchronous>, transform_indices = @transform_0, window_bounds = array<i64: 16, 32>}, {pipeline_mode = #tpu.pipeline_mode<synchronous>, transform_indices = @transform_1, window_bounds = array<i64: 32, 96>}, {pipeline_mode = #tpu.pipeline_mode<synchronous>, transform_indices = @transform_2, window_bounds = array<i64: 1, 96>}, {pipeline_mode = #tpu.pipeline_mode<synchronous>, transform_indices = @transform_3, window_bounds = array<i64: 64, 64>}, {pipeline_mode = #tpu.pipeline_mode<synchronous>, transform_indices = @transform_4, window_bounds = array<i64: 32, 32>}, {pipeline_mode = #tpu.pipeline_mode<synchronous>, transform_indices = @transform_5, window_bounds = array<i64: 1, 32>}, {pipeline_mode = #tpu.pipeline_mode<synchronous>, transform_indices = @transform_6, window_bounds = array<i64: 8, 32>}, {pipeline_mode = #tpu.pipeline_mode<synchronous>, transform_indices = @transform_7, window_bounds = array<i64: 8, 32>}, {pipeline_mode = #tpu.pipeline_mode<synchronous>, transform_indices = @transform_8, window_bounds = array<i64: 32, 32>}, {pipeline_mode = #tpu.pipeline_mode<synchronous>, transform_indices = @transform_9, window_bounds = array<i64: 1, 32>}, {pipeline_mode = #tpu.pipeline_mode<synchronous>, transform_indices = @transform_10, window_bounds = array<i64: 8, 32>}, {pipeline_mode = #tpu.pipeline_mode<synchronous>, transform_indices = @transform_11, window_bounds = array<i64: 8, 32>}, {pipeline_mode = #tpu.pipeline_mode<synchronous>, transform_indices = @transform_12, window_bounds = array<i64: 16, 32>}]} {
    %c0 = arith.constant 0 : index
    %c0_0 = arith.constant 0 : index
    %0 = vector.load %arg1[%c0, %c0_0] : memref<16x32xf32, #tpu.memory_space<vmem>>, vector<16x32xf32>
    %c0_1 = arith.constant 0 : index
    %c0_2 = arith.constant 0 : index
    %1 = vector.load %arg2[%c0_1, %c0_2] : memref<32x96xf32, #tpu.memory_space<vmem>>, vector<32x96xf32>
    %cst = arith.constant dense<0.000000e+00> : vector<16x96xf32>
    %2 = tpu.matmul %0, %1, %cst {dimension_numbers = #tpu.dot_dimension_numbers<[1], [0], [0], [1], [0, 0, 1, 1], [], []>} : vector<16x32xf32>, vector<32x96xf32>, vector<16x96xf32> -> vector<16x96xf32>
    %c0_3 = arith.constant 0 : index
    %c0_4 = arith.constant 0 : index
    %3 = vector.load %arg3[%c0_3, %c0_4] : memref<1x96xf32, #tpu.memory_space<vmem>>, vector<1x96xf32>
    %4 = vector.broadcast %3 : vector<1x96xf32> to vector<16x96xf32>
    %5 = arith.addf %2, %4 : vector<16x96xf32>
    %6 = vector.extract_strided_slice %5 {offsets = [0, 0], sizes = [8, 8], strides = [1, 1]} : vector<16x96xf32> to vector<8x8xf32>
    %7 = vector.extract_strided_slice %5 {offsets = [0, 32], sizes = [8, 8], strides = [1, 1]} : vector<16x96xf32> to vector<8x8xf32>
    %8 = vector.extract_strided_slice %5 {offsets = [0, 64], sizes = [8, 8], strides = [1, 1]} : vector<16x96xf32> to vector<8x8xf32>
    %9 = vector.extract_strided_slice %5 {offsets = [0, 8], sizes = [8, 8], strides = [1, 1]} : vector<16x96xf32> to vector<8x8xf32>
    %10 = vector.extract_strided_slice %5 {offsets = [0, 40], sizes = [8, 8], strides = [1, 1]} : vector<16x96xf32> to vector<8x8xf32>
    %11 = vector.extract_strided_slice %5 {offsets = [0, 72], sizes = [8, 8], strides = [1, 1]} : vector<16x96xf32> to vector<8x8xf32>
    %12 = vector.extract_strided_slice %5 {offsets = [0, 16], sizes = [8, 8], strides = [1, 1]} : vector<16x96xf32> to vector<8x8xf32>
    %13 = vector.extract_strided_slice %5 {offsets = [0, 48], sizes = [8, 8], strides = [1, 1]} : vector<16x96xf32> to vector<8x8xf32>
    %14 = vector.extract_strided_slice %5 {offsets = [0, 80], sizes = [8, 8], strides = [1, 1]} : vector<16x96xf32> to vector<8x8xf32>
    %15 = vector.extract_strided_slice %5 {offsets = [0, 24], sizes = [8, 8], strides = [1, 1]} : vector<16x96xf32> to vector<8x8xf32>
    %16 = vector.extract_strided_slice %5 {offsets = [0, 56], sizes = [8, 8], strides = [1, 1]} : vector<16x96xf32> to vector<8x8xf32>
    %17 = vector.extract_strided_slice %5 {offsets = [0, 88], sizes = [8, 8], strides = [1, 1]} : vector<16x96xf32> to vector<8x8xf32>
    %18 = vector.extract_strided_slice %5 {offsets = [8, 0], sizes = [8, 8], strides = [1, 1]} : vector<16x96xf32> to vector<8x8xf32>
    %19 = vector.extract_strided_slice %5 {offsets = [8, 32], sizes = [8, 8], strides = [1, 1]} : vector<16x96xf32> to vector<8x8xf32>
    %20 = vector.extract_strided_slice %5 {offsets = [8, 64], sizes = [8, 8], strides = [1, 1]} : vector<16x96xf32> to vector<8x8xf32>
    %21 = vector.extract_strided_slice %5 {offsets = [8, 8], sizes = [8, 8], strides = [1, 1]} : vector<16x96xf32> to vector<8x8xf32>
    %22 = vector.extract_strided_slice %5 {offsets = [8, 40], sizes = [8, 8], strides = [1, 1]} : vector<16x96xf32> to vector<8x8xf32>
    %23 = vector.extract_strided_slice %5 {offsets = [8, 72], sizes = [8, 8], strides = [1, 1]} : vector<16x96xf32> to vector<8x8xf32>
    %24 = vector.extract_strided_slice %5 {offsets = [8, 16], sizes = [8, 8], strides = [1, 1]} : vector<16x96xf32> to vector<8x8xf32>
    %25 = vector.extract_strided_slice %5 {offsets = [8, 48], sizes = [8, 8], strides = [1, 1]} : vector<16x96xf32> to vector<8x8xf32>
    %26 = vector.extract_strided_slice %5 {offsets = [8, 80], sizes = [8, 8], strides = [1, 1]} : vector<16x96xf32> to vector<8x8xf32>
    %27 = vector.extract_strided_slice %5 {offsets = [8, 24], sizes = [8, 8], strides = [1, 1]} : vector<16x96xf32> to vector<8x8xf32>
    %28 = vector.extract_strided_slice %5 {offsets = [8, 56], sizes = [8, 8], strides = [1, 1]} : vector<16x96xf32> to vector<8x8xf32>
    %29 = vector.extract_strided_slice %5 {offsets = [8, 88], sizes = [8, 8], strides = [1, 1]} : vector<16x96xf32> to vector<8x8xf32>
    %30 = tpu.concatenate %6, %9, %12, %15, %18, %21, %24, %27 in 0 : vector<8x8xf32>, vector<8x8xf32>, vector<8x8xf32>, vector<8x8xf32>, vector<8x8xf32>, vector<8x8xf32>, vector<8x8xf32>, vector<8x8xf32> -> vector<64x8xf32>
    %31 = tpu.concatenate %7, %10, %13, %16, %19, %22, %25, %28 in 0 : vector<8x8xf32>, vector<8x8xf32>, vector<8x8xf32>, vector<8x8xf32>, vector<8x8xf32>, vector<8x8xf32>, vector<8x8xf32>, vector<8x8xf32> -> vector<64x8xf32>
    %32 = tpu.concatenate %8, %11, %14, %17, %20, %23, %26, %29 in 0 : vector<8x8xf32>, vector<8x8xf32>, vector<8x8xf32>, vector<8x8xf32>, vector<8x8xf32>, vector<8x8xf32>, vector<8x8xf32>, vector<8x8xf32> -> vector<64x8xf32>
    %33 = tpu.transpose %31, [1, 0] : vector<64x8xf32> -> vector<8x64xf32>
    %cst_5 = arith.constant dense<0.000000e+00> : vector<64x64xf32>
    %34 = tpu.matmul %30, %33, %cst_5 {dimension_numbers = #tpu.dot_dimension_numbers<[1], [0], [0], [1], [0, 0, 1, 1], [], []>} : vector<64x8xf32>, vector<8x64xf32>, vector<64x64xf32> -> vector<64x64xf32>
    %cst_6 = arith.constant 0.353553385 : f32
    %35 = vector.broadcast %cst_6 : f32 to vector<64x64xf32>
    %36 = arith.mulf %34, %35 : vector<64x64xf32>
    %c0_7 = arith.constant 0 : index
    %c0_8 = arith.constant 0 : index
    %37 = vector.load %arg4[%c0_7, %c0_8] : memref<64x64xf32, #tpu.memory_space<vmem>>, vector<64x64xf32>
    %38 = arith.addf %36, %37 : vector<64x64xf32>
    %cst_9 = arith.constant dense<0xFF800000> : vector<64xf32>
    %39 = vector.multi_reduction <maximumf>, %38, %cst_9 [1] : vector<64x64xf32> to vector<64xf32>
    %40 = vector.shape_cast %39 : vector<64xf32> to vector<64x1xf32>
    %41 = vector.broadcast %40 : vector<64x1xf32> to vector<64x64xf32>
    %42 = arith.subf %38, %41 : vector<64x64xf32>
    %43 = math.exp %42 : vector<64x64xf32>
    %cst_10 = arith.constant dense<0.000000e+00> : vector<64xf32>
    %44 = vector.multi_reduction <add>, %43, %cst_10 [1] : vector<64x64xf32> to vector<64xf32>
    %45 = vector.shape_cast %44 : vector<64xf32> to vector<64x1xf32>
    %cst_11 = arith.constant 1.000000e+00 : f32
    %46 = vector.broadcast %cst_11 : f32 to vector<64x1xf32>
    %47 = arith.divf %46, %45 : vector<64x1xf32>
    %48 = vector.broadcast %47 : vector<64x1xf32> to vector<64x64xf32>
    %49 = arith.mulf %43, %48 : vector<64x64xf32>
    %cst_12 = arith.constant dense<0.000000e+00> : vector<64x8xf32>
    %50 = tpu.matmul %49, %32, %cst_12 {dimension_numbers = #tpu.dot_dimension_numbers<[1], [0], [0], [1], [0, 0, 1, 1], [], []>} : vector<64x64xf32>, vector<64x8xf32>, vector<64x8xf32> -> vector<64x8xf32>
    %51 = vector.extract_strided_slice %50 {offsets = [0, 0], sizes = [8, 8], strides = [1, 1]} : vector<64x8xf32> to vector<8x8xf32>
    %52 = vector.extract_strided_slice %50 {offsets = [8, 0], sizes = [8, 8], strides = [1, 1]} : vector<64x8xf32> to vector<8x8xf32>
    %53 = vector.extract_strided_slice %50 {offsets = [16, 0], sizes = [8, 8], strides = [1, 1]} : vector<64x8xf32> to vector<8x8xf32>
    %54 = vector.extract_strided_slice %50 {offsets = [24, 0], sizes = [8, 8], strides = [1, 1]} : vector<64x8xf32> to vector<8x8xf32>
    %55 = tpu.concatenate %51, %52, %53, %54 in 1 : vector<8x8xf32>, vector<8x8xf32>, vector<8x8xf32>, vector<8x8xf32> -> vector<8x32xf32>
    %56 = vector.extract_strided_slice %50 {offsets = [32, 0], sizes = [8, 8], strides = [1, 1]} : vector<64x8xf32> to vector<8x8xf32>
    %57 = vector.extract_strided_slice %50 {offsets = [40, 0], sizes = [8, 8], strides = [1, 1]} : vector<64x8xf32> to vector<8x8xf32>
    %58 = vector.extract_strided_slice %50 {offsets = [48, 0], sizes = [8, 8], strides = [1, 1]} : vector<64x8xf32> to vector<8x8xf32>
    %59 = vector.extract_strided_slice %50 {offsets = [56, 0], sizes = [8, 8], strides = [1, 1]} : vector<64x8xf32> to vector<8x8xf32>
    %60 = tpu.concatenate %56, %57, %58, %59 in 1 : vector<8x8xf32>, vector<8x8xf32>, vector<8x8xf32>, vector<8x8xf32> -> vector<8x32xf32>
    %61 = tpu.concatenate %55, %60 in 0 : vector<8x32xf32>, vector<8x32xf32> -> vector<16x32xf32>
    %c0_13 = arith.constant 0 : index
    %c0_14 = arith.constant 0 : index
    %62 = vector.load %arg5[%c0_13, %c0_14] : memref<32x32xf32, #tpu.memory_space<vmem>>, vector<32x32xf32>
    %cst_15 = arith.constant dense<0.000000e+00> : vector<16x32xf32>
    %63 = tpu.matmul %61, %62, %cst_15 {dimension_numbers = #tpu.dot_dimension_numbers<[1], [0], [0], [1], [0, 0, 1, 1], [], []>} : vector<16x32xf32>, vector<32x32xf32>, vector<16x32xf32> -> vector<16x32xf32>
    %c0_16 = arith.constant 0 : index
    %c0_17 = arith.constant 0 : index
    %64 = vector.load %arg6[%c0_16, %c0_17] : memref<1x32xf32, #tpu.memory_space<vmem>>, vector<1x32xf32>
    %65 = vector.broadcast %64 : vector<1x32xf32> to vector<16x32xf32>
    %66 = arith.addf %63, %65 : vector<16x32xf32>
    %67 = arith.addf %66, %0 : vector<16x32xf32>
    %c0_18 = arith.constant 0 : index
    %c0_19 = arith.constant 0 : index
    %68 = vector.load %arg7[%c0_18, %c0_19] : memref<8x32xf32, #tpu.memory_space<vmem>>, vector<8x32xf32>
    %c0_20 = arith.constant 0 : index
    %c0_21 = arith.constant 0 : index
    %69 = vector.load %arg8[%c0_20, %c0_21] : memref<8x32xf32, #tpu.memory_space<vmem>>, vector<8x32xf32>
    %70 = vector.extract_strided_slice %67 {offsets = [0, 0], sizes = [8, 32], strides = [1, 1]} : vector<16x32xf32> to vector<8x32xf32>
    %71 = vector.shape_cast %70 : vector<8x32xf32> to vector<1x8x32xf32>
    %cst_22 = arith.constant dense<0.000000e+00> : vector<1xf32>
    %72 = vector.multi_reduction <add>, %71, %cst_22 [1, 2] : vector<1x8x32xf32> to vector<1xf32>
    %73 = vector.shape_cast %72 : vector<1xf32> to vector<1x1x1xf32>
    %74 = vector.extract %73[0, 0, 0] : f32 from vector<1x1x1xf32>
    %cst_23 = arith.constant 3.906250e-03 : f32
    %75 = arith.mulf %74, %cst_23 : f32
    %76 = arith.mulf %70, %70 : vector<8x32xf32>
    %77 = vector.shape_cast %76 : vector<8x32xf32> to vector<1x8x32xf32>
    %cst_24 = arith.constant dense<0.000000e+00> : vector<1xf32>
    %78 = vector.multi_reduction <add>, %77, %cst_24 [1, 2] : vector<1x8x32xf32> to vector<1xf32>
    %79 = vector.shape_cast %78 : vector<1xf32> to vector<1x1x1xf32>
    %80 = vector.extract %79[0, 0, 0] : f32 from vector<1x1x1xf32>
    %cst_25 = arith.constant 3.906250e-03 : f32
    %81 = arith.mulf %80, %cst_25 : f32
    %82 = arith.mulf %75, %75 : f32
    %83 = arith.subf %81, %82 : f32
    %84 = vector.broadcast %75 : f32 to vector<8x32xf32>
    %85 = arith.subf %70, %84 : vector<8x32xf32>
    %cst_26 = arith.constant 9.99999974E-6 : f32
    %86 = arith.addf %83, %cst_26 : f32
    %87 = math.rsqrt %86 : f32
    %88 = vector.broadcast %87 : f32 to vector<8x32xf32>
    %89 = arith.mulf %85, %88 : vector<8x32xf32>
    %90 = arith.mulf %89, %68 : vector<8x32xf32>
    %91 = arith.addf %90, %69 : vector<8x32xf32>
    %92 = vector.extract_strided_slice %67 {offsets = [8, 0], sizes = [8, 32], strides = [1, 1]} : vector<16x32xf32> to vector<8x32xf32>
    %93 = vector.shape_cast %92 : vector<8x32xf32> to vector<1x8x32xf32>
    %cst_27 = arith.constant dense<0.000000e+00> : vector<1xf32>
    %94 = vector.multi_reduction <add>, %93, %cst_27 [1, 2] : vector<1x8x32xf32> to vector<1xf32>
    %95 = vector.shape_cast %94 : vector<1xf32> to vector<1x1x1xf32>
    %96 = vector.extract %95[0, 0, 0] : f32 from vector<1x1x1xf32>
    %cst_28 = arith.constant 3.906250e-03 : f32
    %97 = arith.mulf %96, %cst_28 : f32
    %98 = arith.mulf %92, %92 : vector<8x32xf32>
    %99 = vector.shape_cast %98 : vector<8x32xf32> to vector<1x8x32xf32>
    %cst_29 = arith.constant dense<0.000000e+00> : vector<1xf32>
    %100 = vector.multi_reduction <add>, %99, %cst_29 [1, 2] : vector<1x8x32xf32> to vector<1xf32>
    %101 = vector.shape_cast %100 : vector<1xf32> to vector<1x1x1xf32>
    %102 = vector.extract %101[0, 0, 0] : f32 from vector<1x1x1xf32>
    %cst_30 = arith.constant 3.906250e-03 : f32
    %103 = arith.mulf %102, %cst_30 : f32
    %104 = arith.mulf %97, %97 : f32
    %105 = arith.subf %103, %104 : f32
    %106 = vector.broadcast %97 : f32 to vector<8x32xf32>
    %107 = arith.subf %92, %106 : vector<8x32xf32>
    %cst_31 = arith.constant 9.99999974E-6 : f32
    %108 = arith.addf %105, %cst_31 : f32
    %109 = math.rsqrt %108 : f32
    %110 = vector.broadcast %109 : f32 to vector<8x32xf32>
    %111 = arith.mulf %107, %110 : vector<8x32xf32>
    %112 = arith.mulf %111, %68 : vector<8x32xf32>
    %113 = arith.addf %112, %69 : vector<8x32xf32>
    %114 = tpu.concatenate %91, %113 in 0 : vector<8x32xf32>, vector<8x32xf32> -> vector<16x32xf32>
    %c0_32 = arith.constant 0 : index
    %c0_33 = arith.constant 0 : index
    %115 = vector.load %arg9[%c0_32, %c0_33] : memref<32x32xf32, #tpu.memory_space<vmem>>, vector<32x32xf32>
    %cst_34 = arith.constant dense<0.000000e+00> : vector<16x32xf32>
    %116 = tpu.matmul %114, %115, %cst_34 {dimension_numbers = #tpu.dot_dimension_numbers<[1], [0], [0], [1], [0, 0, 1, 1], [], []>} : vector<16x32xf32>, vector<32x32xf32>, vector<16x32xf32> -> vector<16x32xf32>
    %c0_35 = arith.constant 0 : index
    %c0_36 = arith.constant 0 : index
    %117 = vector.load %arg10[%c0_35, %c0_36] : memref<1x32xf32, #tpu.memory_space<vmem>>, vector<1x32xf32>
    %118 = vector.broadcast %117 : vector<1x32xf32> to vector<16x32xf32>
    %119 = arith.addf %116, %118 : vector<16x32xf32>
    %120 = arith.addf %119, %114 : vector<16x32xf32>
    %c0_37 = arith.constant 0 : index
    %c0_38 = arith.constant 0 : index
    %121 = vector.load %arg11[%c0_37, %c0_38] : memref<8x32xf32, #tpu.memory_space<vmem>>, vector<8x32xf32>
    %c0_39 = arith.constant 0 : index
    %c0_40 = arith.constant 0 : index
    %122 = vector.load %arg12[%c0_39, %c0_40] : memref<8x32xf32, #tpu.memory_space<vmem>>, vector<8x32xf32>
    %123 = vector.extract_strided_slice %120 {offsets = [0, 0], sizes = [8, 32], strides = [1, 1]} : vector<16x32xf32> to vector<8x32xf32>
    %124 = vector.shape_cast %123 : vector<8x32xf32> to vector<1x8x32xf32>
    %cst_41 = arith.constant dense<0.000000e+00> : vector<1xf32>
    %125 = vector.multi_reduction <add>, %124, %cst_41 [1, 2] : vector<1x8x32xf32> to vector<1xf32>
    %126 = vector.shape_cast %125 : vector<1xf32> to vector<1x1x1xf32>
    %127 = vector.extract %126[0, 0, 0] : f32 from vector<1x1x1xf32>
    %cst_42 = arith.constant 3.906250e-03 : f32
    %128 = arith.mulf %127, %cst_42 : f32
    %129 = arith.mulf %123, %123 : vector<8x32xf32>
    %130 = vector.shape_cast %129 : vector<8x32xf32> to vector<1x8x32xf32>
    %cst_43 = arith.constant dense<0.000000e+00> : vector<1xf32>
    %131 = vector.multi_reduction <add>, %130, %cst_43 [1, 2] : vector<1x8x32xf32> to vector<1xf32>
    %132 = vector.shape_cast %131 : vector<1xf32> to vector<1x1x1xf32>
    %133 = vector.extract %132[0, 0, 0] : f32 from vector<1x1x1xf32>
    %cst_44 = arith.constant 3.906250e-03 : f32
    %134 = arith.mulf %133, %cst_44 : f32
    %135 = arith.mulf %128, %128 : f32
    %136 = arith.subf %134, %135 : f32
    %137 = vector.broadcast %128 : f32 to vector<8x32xf32>
    %138 = arith.subf %123, %137 : vector<8x32xf32>
    %cst_45 = arith.constant 9.99999974E-6 : f32
    %139 = arith.addf %136, %cst_45 : f32
    %140 = math.rsqrt %139 : f32
    %141 = vector.broadcast %140 : f32 to vector<8x32xf32>
    %142 = arith.mulf %138, %141 : vector<8x32xf32>
    %143 = arith.mulf %142, %121 : vector<8x32xf32>
    %144 = arith.addf %143, %122 : vector<8x32xf32>
    %145 = vector.extract_strided_slice %120 {offsets = [8, 0], sizes = [8, 32], strides = [1, 1]} : vector<16x32xf32> to vector<8x32xf32>
    %146 = vector.shape_cast %145 : vector<8x32xf32> to vector<1x8x32xf32>
    %cst_46 = arith.constant dense<0.000000e+00> : vector<1xf32>
    %147 = vector.multi_reduction <add>, %146, %cst_46 [1, 2] : vector<1x8x32xf32> to vector<1xf32>
    %148 = vector.shape_cast %147 : vector<1xf32> to vector<1x1x1xf32>
    %149 = vector.extract %148[0, 0, 0] : f32 from vector<1x1x1xf32>
    %cst_47 = arith.constant 3.906250e-03 : f32
    %150 = arith.mulf %149, %cst_47 : f32
    %151 = arith.mulf %145, %145 : vector<8x32xf32>
    %152 = vector.shape_cast %151 : vector<8x32xf32> to vector<1x8x32xf32>
    %cst_48 = arith.constant dense<0.000000e+00> : vector<1xf32>
    %153 = vector.multi_reduction <add>, %152, %cst_48 [1, 2] : vector<1x8x32xf32> to vector<1xf32>
    %154 = vector.shape_cast %153 : vector<1xf32> to vector<1x1x1xf32>
    %155 = vector.extract %154[0, 0, 0] : f32 from vector<1x1x1xf32>
    %cst_49 = arith.constant 3.906250e-03 : f32
    %156 = arith.mulf %155, %cst_49 : f32
    %157 = arith.mulf %150, %150 : f32
    %158 = arith.subf %156, %157 : f32
    %159 = vector.broadcast %150 : f32 to vector<8x32xf32>
    %160 = arith.subf %145, %159 : vector<8x32xf32>
    %cst_50 = arith.constant 9.99999974E-6 : f32
    %161 = arith.addf %158, %cst_50 : f32
    %162 = math.rsqrt %161 : f32
    %163 = vector.broadcast %162 : f32 to vector<8x32xf32>
    %164 = arith.mulf %160, %163 : vector<8x32xf32>
    %165 = arith.mulf %164, %121 : vector<8x32xf32>
    %166 = arith.addf %165, %122 : vector<8x32xf32>
    %167 = tpu.concatenate %144, %166 in 0 : vector<8x32xf32>, vector<8x32xf32> -> vector<16x32xf32>
    %c0_51 = arith.constant 0 : index
    %c0_52 = arith.constant 0 : index
    %168 = vector.load %arg13[%c0_51, %c0_52] : memref<16x32xf32, #tpu.memory_space<vmem>>, vector<16x32xf32>
    tpu.vector_store %arg13[%c0_51, %c0_52], %167 {strides = array<i32>} : memref<16x32xf32, #tpu.memory_space<vmem>>, vector<16x32xf32>,
    return
  }
  func.func @transform_0(%arg0: i32) -> (i32, i32) {
    %c0_i32 = arith.constant 0 : i32
    %c0_i32_0 = arith.constant 0 : i32
    %c0_i32_1 = arith.constant 0 : i32
    return %c0_i32, %c0_i32_0 : i32, i32
  }
  func.func @transform_1(%arg0: i32) -> (i32, i32) {
    %c0_i32 = arith.constant 0 : i32
    %c0_i32_0 = arith.constant 0 : i32
    %c0_i32_1 = arith.constant 0 : i32
    return %c0_i32, %c0_i32_0 : i32, i32
  }
  func.func @transform_2(%arg0: i32) -> (i32, i32) {
    %c0_i32 = arith.constant 0 : i32
    %c0_i32_0 = arith.constant 0 : i32
    %c0_i32_1 = arith.constant 0 : i32
    return %c0_i32, %c0_i32_0 : i32, i32
  }
  func.func @transform_3(%arg0: i32) -> (i32, i32) {
    %c0_i32 = arith.constant 0 : i32
    %c0_i32_0 = arith.constant 0 : i32
    %c0_i32_1 = arith.constant 0 : i32
    return %c0_i32, %c0_i32_0 : i32, i32
  }
  func.func @transform_4(%arg0: i32) -> (i32, i32) {
    %c0_i32 = arith.constant 0 : i32
    %c0_i32_0 = arith.constant 0 : i32
    %c0_i32_1 = arith.constant 0 : i32
    return %c0_i32, %c0_i32_0 : i32, i32
  }
  func.func @transform_5(%arg0: i32) -> (i32, i32) {
    %c0_i32 = arith.constant 0 : i32
    %c0_i32_0 = arith.constant 0 : i32
    %c0_i32_1 = arith.constant 0 : i32
    return %c0_i32, %c0_i32_0 : i32, i32
  }
  func.func @transform_6(%arg0: i32) -> (i32, i32) {
    %c0_i32 = arith.constant 0 : i32
    %c0_i32_0 = arith.constant 0 : i32
    %c0_i32_1 = arith.constant 0 : i32
    return %c0_i32, %c0_i32_0 : i32, i32
  }
  func.func @transform_7(%arg0: i32) -> (i32, i32) {
    %c0_i32 = arith.constant 0 : i32
    %c0_i32_0 = arith.constant 0 : i32
    %c0_i32_1 = arith.constant 0 : i32
    return %c0_i32, %c0_i32_0 : i32, i32
  }
  func.func @transform_8(%arg0: i32) -> (i32, i32) {
    %c0_i32 = arith.constant 0 : i32
    %c0_i32_0 = arith.constant 0 : i32
    %c0_i32_1 = arith.constant 0 : i32
    return %c0_i32, %c0_i32_0 : i32, i32
  }
  func.func @transform_9(%arg0: i32) -> (i32, i32) {
    %c0_i32 = arith.constant 0 : i32
    %c0_i32_0 = arith.constant 0 : i32
    %c0_i32_1 = arith.constant 0 : i32
    return %c0_i32, %c0_i32_0 : i32, i32
  }
  func.func @transform_10(%arg0: i32) -> (i32, i32) {
    %c0_i32 = arith.constant 0 : i32
    %c0_i32_0 = arith.constant 0 : i32
    %c0_i32_1 = arith.constant 0 : i32
    return %c0_i32, %c0_i32_0 : i32, i32
  }
  func.func @transform_11(%arg0: i32) -> (i32, i32) {
    %c0_i32 = arith.constant 0 : i32
    %c0_i32_0 = arith.constant 0 : i32
    %c0_i32_1 = arith.constant 0 : i32
    return %c0_i32, %c0_i32_0 : i32, i32
  }
  func.func @transform_12(%arg0: i32) -> (i32, i32) {
    %c0_i32 = arith.constant 0 : i32
    %c0_i32_0 = arith.constant 0 : i32
    %c0_i32_1 = arith.constant 0 : i32
    return %c0_i32, %c0_i32_0 : i32, i32
  }
}

</mosaic_0001>

<bundles_post_ra>
// kernel: tpu_custom_call.1
= control target key start
LH: loop header
LB: loop body
LE: loop exit
PB: predicated region body
PF: predicated region fallthrough
CT: control target
= control target key end

     0   :  { %17 = vsyncpa [#allocation3], 0  ;;  %s1929_s0 = inlined_call_operand.hbm [shape: f32[16,32], index: 0, kind: input, shape index: {}]   ;;  %s1930_s1 = inlined_call_operand.hbm [shape: f32[32,96], index: 1, kind: input, shape index: {}]   ;;  %s1931_s2 = inlined_call_operand.vmem [shape: f32[1,96], index: 2, kind: input, shape index: {}]   ;;  %s1932_s3 = inlined_call_operand.hbm [shape: f32[64,64], index: 3, kind: input, shape index: {}]   ;;  %s1933_s4 = inlined_call_operand.hbm [shape: f32[32,32], index: 4, kind: input, shape index: {}]   ;;  %s1934_s5 = inlined_call_operand.vmem [shape: f32[1,32], index: 5, kind: input, shape index: {}]   ;;  %s1935_s6 = inlined_call_operand.vmem [shape: f32[8,32], index: 6, kind: input, shape index: {}]   ;;  %s1936_s7 = inlined_call_operand.vmem [shape: f32[8,32], index: 7, kind: input, shape index: {}]   ;;  %s1937_s8 = inlined_call_operand.hbm [shape: f32[32,32], index: 8, kind: input, shape index: {}]   ;;  %s1938_s9 = inlined_call_operand.hbm [shape: f32[1,32], index: 9, kind: input, shape index: {}]   ;;  %s1939_s10 = inlined_call_operand.vmem [shape: f32[8,32], index: 10, kind: input, shape index: {}]   ;;  %s1940_s11 = inlined_call_operand.vmem [shape: f32[8,32], index: 11, kind: input, shape index: {}]   ;;  %s1941_s12 = inlined_call_operand.hbm [shape: f32[16,32], index: 12, kind: output, shape index: {}]  }
   0x1   :  { %18 = vsyncpa [#allocation6], 0 }
   0x2   :  { %19 = vsyncpa [#allocation9], 0 }
   0x3   :  { %20 = vsyncpa [#allocation12], 0 }
   0x4   :  { %21 = vsyncpa [#allocation4], 0  ;;  %s1565_s21 = smov [#allocation5]   ;;  %s1566_s23 = smov [#allocation8]  }
   0x5   :  { %s39_s22 = sshll.u32 %s1565_s21, 4  ;;  %s65_s24 = sshll.u32 %s1566_s23, 4  ;;  %s40_s22 = int_to_ptr.vmem [resolvable:$true] %s39_s22  ;;  %s1646_s24 = int_to_ptr.vmem [resolvable:$true] %s65_s24 }
   0x6   :  { %s1401_s27 = scalar_lea.hbm %s1930_s1, 512 }
   0x7   :  { %p1402_p0 = scmp.ne.s32.totalorder %s1930_s1, %s1401_s27  ;;  %p1405_p1 = scmp.lt.u32.totalorder %s1401_s27, %s1930_s1 }
   0x9   :  { %p1407_p2 = pnand %p1405_p1, %p1402_p0 }
   0xb   :  { %1410 = shalt.err (!%p1407_p2)
}
   0xc   :  { %s1411_s14 = scalar_lea.vmem %s40_s22, 512  ;;  %p1416_p4 = scmp.lt.s32.totalorder %s40_s22, %s40_s22 }
   0xd   :  { %p1412_p3 = scmp.ne.s32.totalorder %s40_s22, %s1411_s14  ;;  %p1417_p5 = scmp.lt.s32.totalorder %s1411_s14, %s1411_s14 }
   0xf   :  { %p1418_p6 = por %p1417_p5, %p1416_p4 }
  0x11   :  { %p1419_p7 = pnand %p1418_p6, %p1412_p3 }
  0x13   :  { %1422 = shalt.err (!%p1419_p7)
}
  0x14   :  { %s1567_s15 = smov 128   ;;  %s1568_s16 = smov 8  }
  0x15   :  { %45 = dma.hbm_to_vmem [thread:$0]  %s1930_s1, 512, %s40_s22, [#allocation6], %s1567_s15, %s1567_s15, %s1568_s16  }
  0x16   :  { %s1423_s21 = scalar_lea.hbm %s1933_s4, 512 }
  0x17   :  { %p1424_p8 = scmp.ne.s32.totalorder %s1933_s4, %s1423_s21  ;;  %p1427_p9 = scmp.lt.u32.totalorder %s1423_s21, %s1933_s4 }
  0x19   :  { %p1429_p10 = pnand %p1427_p9, %p1424_p8 }
  0x1b   :  { %1432 = shalt.err (!%p1429_p10)
}
  0x1c   :  { %s1433_s28 = scalar_lea.vmem %s1646_s24, 512  ;;  %p1438_p12 = scmp.lt.s32.totalorder %s1646_s24, %s1646_s24 }
  0x1d   :  { %p1434_p11 = scmp.ne.s32.totalorder %s1646_s24, %s1433_s28  ;;  %p1439_p13 = scmp.lt.s32.totalorder %s1433_s28, %s1433_s28 }
  0x1f   :  { %p1440_p0 = por %p1439_p13, %p1438_p12 }
  0x21   :  { %p1441_p1 = pnand %p1440_p0, %p1434_p11 }
  0x23   :  { %1444 = shalt.err (!%p1441_p1)
}
  0x24   :  { %71 = dma.hbm_to_vmem [thread:$0]  %s1933_s4, 512, %s1646_s24, [#allocation9], %s1567_s15, %s1567_s15, %s1568_s16  }
  0x25   :  { %s1569_s29 = smov [#allocation2]   ;;  %s1570_s13 = smov [#allocation7]  }
  0x26   :  { %s27_s30 = sshll.u32 %s1569_s29, 4  ;;  %s53_s14 = sshll.u32 %s1570_s13, 4  ;;  %s28_s30 = int_to_ptr.vmem [resolvable:$true] %s27_s30  ;;  %s1683_s14 = int_to_ptr.vmem [resolvable:$true] %s53_s14 }
  0x27   :  { %s1445_s19 = scalar_lea.hbm %s1929_s0, 256 }
  0x28   :  { %p1446_p2 = scmp.ne.s32.totalorder %s1929_s0, %s1445_s19  ;;  %p1449_p3 = scmp.lt.u32.totalorder %s1445_s19, %s1929_s0 }
  0x2a   :  { %p1451_p4 = pnand %p1449_p3, %p1446_p2 }
  0x2c   :  { %1454 = shalt.err (!%p1451_p4)
}
  0x2d   :  { %s1455_s4 = scalar_lea.vmem %s28_s30, 256  ;;  %p1460_p6 = scmp.lt.s32.totalorder %s28_s30, %s28_s30 }
  0x2e   :  { %p1456_p5 = scmp.ne.s32.totalorder %s28_s30, %s1455_s4  ;;  %p1461_p7 = scmp.lt.s32.totalorder %s1455_s4, %s1455_s4 }
  0x30   :  { %p1462_p8 = por %p1461_p7, %p1460_p6 }
  0x32   :  { %p1463_p9 = pnand %p1462_p8, %p1456_p5 }
  0x34   :  { %1466 = shalt.err (!%p1463_p9)
}
  0x35   :  { %33 = dma.hbm_to_vmem [thread:$0]  %s1929_s0, 256, %s28_s30, [#allocation3], %s1567_s15, %s1567_s15, %s1568_s16  }
  0x36   :  { %s1467_s1 = scalar_lea.hbm %s1932_s3, 1024 }
  0x37   :  { %p1468_p10 = scmp.ne.s32.totalorder %s1932_s3, %s1467_s1  ;;  %p1471_p11 = scmp.lt.u32.totalorder %s1467_s1, %s1932_s3 }
  0x39   :  { %p1473_p12 = pnand %p1471_p11, %p1468_p10 }
  0x3b   :  { %1476 = shalt.err (!%p1473_p12)
}
  0x3c   :  { %s1477_s18 = scalar_lea.vmem %s1683_s14, 1024  ;;  %p1482_p0 = scmp.lt.s32.totalorder %s1683_s14, %s1683_s14 }
  0x3d   :  { %p1478_p13 = scmp.ne.s32.totalorder %s1683_s14, %s1477_s18  ;;  %p1483_p1 = scmp.lt.s32.totalorder %s1477_s18, %s1477_s18 }
  0x3f   :  { %p1484_p2 = por %p1483_p1, %p1482_p0 }
  0x41   :  { %p1485_p3 = pnand %p1484_p2, %p1478_p13 }
  0x43   :  { %1488 = shalt.err (!%p1485_p3)
}
  0x44   :  { %59 = dma.hbm_to_vmem [thread:$0]  %s1932_s3, 1024, %s1683_s14, [#allocation6], %s1567_s15, %s1567_s15, %s1568_s16  }
  0x45   :  { %s1571_s19 = smov [#allocation10]   ;;  %s1572_s21 = smov [#allocation11]  }
  0x46   :  { %s83_s20 = sshll.u32 %s1571_s19, 4  ;;  %s96_s23 = sshll.u32 %s1572_s21, 4  ;;  %s84_s20 = int_to_ptr.vmem [resolvable:$true] %s83_s20  ;;  %s97_s23 = int_to_ptr.vmem [resolvable:$true] %s96_s23 }
  0x47   :  { %s1489_s24 = scalar_lea.hbm %s1937_s8, 512 }
  0x48   :  { %p1490_p4 = scmp.ne.s32.totalorder %s1937_s8, %s1489_s24  ;;  %p1493_p5 = scmp.lt.u32.totalorder %s1489_s24, %s1937_s8 }
  0x4a   :  { %p1495_p6 = pnand %p1493_p5, %p1490_p4 }
  0x4c   :  { %1498 = shalt.err (!%p1495_p6)
}
  0x4d   :  { %s1499_s3 = scalar_lea.vmem %s84_s20, 512  ;;  %p1504_p8 = scmp.lt.s32.totalorder %s84_s20, %s84_s20 }
  0x4e   :  { %p1500_p7 = scmp.ne.s32.totalorder %s84_s20, %s1499_s3  ;;  %p1505_p9 = scmp.lt.s32.totalorder %s1499_s3, %s1499_s3 }
  0x50   :  { %p1506_p10 = por %p1505_p9, %p1504_p8 }
  0x52   :  { %p1507_p11 = pnand %p1506_p10, %p1500_p7 }
  0x54   :  { %1510 = shalt.err (!%p1507_p11)
}
  0x55   :  { %89 = dma.hbm_to_vmem [thread:$0]  %s1937_s8, 512, %s84_s20, [#allocation9], %s1567_s15, %s1567_s15, %s1568_s16  }
  0x56   :  { %s1511_s17 = scalar_lea.hbm %s1938_s9, 16 }
  0x57   :  { %p1512_p12 = scmp.ne.s32.totalorder %s1938_s9, %s1511_s17  ;;  %p1515_p13 = scmp.lt.u32.totalorder %s1511_s17, %s1938_s9 }
  0x59   :  { %p1517_p0 = pnand %p1515_p13, %p1512_p12 }
  0x5b   :  { %1520 = shalt.err (!%p1517_p0)
}
  0x5c   :  { %s1521_s21 = scalar_lea.vmem %s97_s23, 16  ;;  %s1525_s25 = scalar_lea.vmem %s97_s23, 32 }
  0x5d   :  { %p1522_p1 = scmp.ne.s32.totalorder %s97_s23, %s1521_s21  ;;  %p1526_p2 = scmp.lt.s32.totalorder %s97_s23, %s97_s23 }
  0x5e   :  { %p1527_p3 = scmp.lt.s32.totalorder %s1525_s25, %s1521_s21 }
  0x60   :  { %p1528_p4 = por %p1527_p3, %p1526_p2 }
  0x62   :  { %p1529_p5 = pnand %p1528_p4, %p1522_p1 }
  0x64   :  { %1532 = shalt.err (!%p1529_p5)
}
  0x65   :  { %99 = dma.hbm_to_vmem [thread:$0]  %s1938_s9, 16, %s97_s23, [#allocation12]  }
  0x66   :  { %1555 = dma.done.wait [#allocation3], 256  }
  0x67   :  { %1556 = vsyncadd [#allocation3], 4294967040 }
  0x68   :  { %1557 = dma.done.wait [#allocation6], 1536  }
  0x69   :  { %1558 = vsyncadd [#allocation6], 4294965760 }
  0x6a   :  { %1559 = dma.done.wait [#allocation9], 1024  }
  0x6b   :  { %1560 = vsyncadd [#allocation9], 4294966272 }
  0x6c   :  { %1561 = dma.done.wait [#allocation12], 16  }
  0x6d   :  { %1562 = vsyncadd [#allocation12], 4294967280  ;;  %vm135_vm0 = vcmask 261120   ;;  %v124_v0 = vld [vmem:[#allocation5] sm:$0xff]  ;;  %v125_v1 = vld [vmem:[#allocation5 + $0x8] sm:$0xff]  ;;  %vm247_vm1 = vcmask 64512  }
  0x6e   :  { %v126_v2 = vld [vmem:[#allocation5 + $0x10] sm:$0xff]  ;;  %v1217_v3 = vpack.c.bf16 %v125_v1, %v124_v0  ;;  %v127_v4 = vld [vmem:[#allocation5 + $0x18] sm:$0xff]  ;;  %s1573_s4 = smov 104   ;;  %s1574_s24 = smov 120   ;;  %vm1773_vm2 = vmpackc.low %vm247_vm1, %vm247_vm1  ;;  %vm409_vm3 = vcmask 523264   ;;  %vm672_vm4 = vcmask 130048  }
  0x6f   :  { %v1747_v5 = vld [vmem:[#allocation2] sm:$0xff]  ;;  %v1221_v6 = vpack.c.bf16 %v127_v4, %v126_v2  ;;  %v1751_v7 = vld [vmem:[#allocation2 + $0x8] sm:$0xff]  ;;  %s1575_s26 = smov 112   ;;  %v394_v41 = vld [vmem:[#allocation7 + $0x8] sm:$0xff]  ;;  %s1577_s27 = smov 64   ;;  %vm674_vm5 = vcmask 195584  }
  0x70   :  { %1136 = vmatprep.mubr.msk.f32.mxu0 %vm135_vm0, %v1747_v5  ;;  %1218 = vmatprep.subr.bf16.mxu0 %v1217_v3  ;;  %v1045_v8 = vld [vmem:[%s1931_s2] ss:$0 sm:$0xff]  ;;  %s1576_s2 = smov 96   ;;  %v393_v44 = vld [vmem:[#allocation7] sm:$0xff]  ;;  %v396_v55 = vld [vmem:[#allocation7 + $0x18] sm:$0xff]  ;;  %s1578_s28 = smov 24  }
  0x71   :  { %1220 = vmatpush3.bf16.msra.mxu0 %v1217_v3  ;;  %v395_v52 = vld [vmem:[#allocation7 + $0x10] sm:$0xff]  ;;  %v397_v60 = vld [vmem:[#allocation7 + $0x20] sm:$0xff]  ;;  %v398_v0 = vld [vmem:[#allocation7 + $0x28] sm:$0xff]  ;;  %s1579_s1 = smov 16   ;;  %s1580_s9 = smov [#allocation13]  }
  0x72   :  { %1222 = vmatprep.subr.bf16.mxu0 %v1221_v6  ;;  %v399_v4 = vld [vmem:[#allocation7 + $0x30] sm:$0xff] }
  0x75   :  { %1224 = vmatpush3.bf16.msra.mxu0 %v1221_v6 }
  0x78   :  { %1137 = vmatmul.mubr.msk.f32.vlgmr.msra.gmra.mrb[0].mxu0 %vm135_vm0, %v1751_v7 }
 0x14b   :  { %v1138_v9 = vpop.f32.mrb[0].mxu0 }
 0x14c   :  { %v208_v10 = vpop.f32.mrb[1].mxu0  ;;  %v214_v12 = vadd.f32 %v1138_v9, %v1045_v8 }
 0x14d   :  { %v209_v11 = vadd.f32 %v1045_v8, %v208_v10 }
 0x14f   :  { %222 = vrot.lane.b32.xlu1 %v209_v11, %s1573_s4  ;;  %218 = vrot.lane.b32.xlu0 %v209_v11, %s1574_s24 }
 0x150   :  { %1155 = vmatprep.mubr.msk.f32.mxu1 %vm247_vm1, %v209_v11 }
 0x153   :  { %225 = vrot.lane.b32.xlu1 %v214_v12, %s1574_s24  ;;  %220 = vrot.lane.b32.xlu0 %v209_v11, %s1575_s26 }
 0x157   :  { %229 = vrot.lane.b32.xlu1 %v214_v12, %s1573_s4  ;;  %227 = vrot.lane.b32.xlu0 %v214_v12, %s1575_s26 }
 0x1c1   :  { %v223_v13 = vpop.permute.xlu1 %222  ;;  %v219_v14 = vpop.permute.xlu0 %218 }
 0x1c2   :  { %v1759_v15 = vpack.i.bf16 %v219_v14, %v209_v11 }
 0x1c4   :  { %1322 = vrot.lane.b32.xlu0 %v1759_v15, %s1576_s2 }
 0x1c5   :  { %v226_v16 = vpop.permute.xlu1 %225  ;;  %v221_v17 = vpop.permute.xlu0 %220 }
 0x1c6   :  { %v1762_v18 = vpack.i.bf16 %v226_v16, %v214_v12  ;;  %v1764_v19 = vpack.i.bf16 %v223_v13, %v221_v17 }
 0x1c8   :  { %1332 = vrot.lane.b32.xlu0 %v1762_v18, %s1576_s2  ;;  %1327 = vrot.lane.b32.xlu1 %v1764_v19, %s1576_s2 }
 0x1c9   :  { %v230_v20 = vpop.permute.xlu1 %229  ;;  %v228_v21 = vpop.permute.xlu0 %227 }
 0x1ca   :  { %v1768_v22 = vpack.i.bf16 %v230_v20, %v228_v21 }
 0x1cc   :  { %1337 = vrot.lane.b32.xlu1 %v1768_v22, %s1576_s2 }
 0x236   :  { %v1323_v23 = vpop.permute.xlu0 %1322 }
 0x237   :  { %v1325_v24 = vunpack.i.h.bf16 %v1323_v23  ;;  %v1324_v25 = vunpack.i.l.bf16 %v1323_v23 }
 0x239   :  { %v1225_v27 = vpack.c.bf16 %v1325_v24, %v1324_v25 }
 0x23a   :  { %v1328_v28 = vpop.permute.xlu1 %1327  ;;  %v1333_v31 = vpop.permute.xlu0 %1332 }
 0x23b   :  { %v1330_v29 = vunpack.i.h.bf16 %v1328_v28  ;;  %v1329_v30 = vunpack.i.l.bf16 %v1328_v28  ;;  %1227 = vmatprep.subr.msk.bf16.mxu1 %vm1773_vm2, %v1225_v27  ;;  %v1335_v33 = vunpack.i.h.bf16 %v1333_v31  ;;  %v1334_v34 = vunpack.i.l.bf16 %v1333_v31 }
 0x23c   :  { %1230 = vmatpush3.bf16.xpose.msk.msra.mxu1 %vm1773_vm2, %v1225_v27 }
 0x23d   :  { %v1231_v32 = vpack.c.bf16 %v1330_v29, %v1329_v30  ;;  %v1237_v35 = vpack.c.bf16 %v1335_v33, %v1334_v34 }
 0x23e   :  { %v1338_v36 = vpop.permute.xlu1 %1337 }
 0x23f   :  { %1233 = vmatprep.subr.msk.bf16.mxu1 %vm1773_vm2, %v1231_v32  ;;  %v1340_v37 = vunpack.i.h.bf16 %v1338_v36  ;;  %v1339_v38 = vunpack.i.l.bf16 %v1338_v36 }
 0x241   :  { %v1243_v39 = vpack.c.bf16 %v1340_v37, %v1339_v38 }
 0x244   :  { %1236 = vmatpush3.bf16.xpose.msk.msra.mxu1 %vm1773_vm2, %v1231_v32 }
 0x245   :  { %1239 = vmatprep.subr.msk.bf16.mxu1 %vm1773_vm2, %v1237_v35 }
 0x24c   :  { %1242 = vmatpush3.bf16.xpose.msk.msra.mxu1 %vm1773_vm2, %v1237_v35 }
 0x24d   :  { %1245 = vmatprep.subr.msk.bf16.mxu1 %vm1773_vm2, %v1243_v39 }
 0x254   :  { %1248 = vmatpush3.bf16.xpose.msk.msra.mxu1 %vm1773_vm2, %v1243_v39 }
 0x25b   :  { %1156 = vmatmul.mubr.msk.f32.vlgmr.msra.gmra.mrb[0].mxu1 %vm247_vm1, %v219_v14 }
 0x25c   :  { %1158 = vmatprep.mubr.msk.f32.mxu1 %vm247_vm1, %v221_v17 }
 0x25f   :  { %1159 = vmatmul.mubr.msk.f32.gmra.mrb[2].mxu1 %vm247_vm1, %v223_v13 }
 0x260   :  { %1161 = vmatprep.mubr.msk.f32.mxu1 %vm247_vm1, %v214_v12  ;;  %v400_v12 = vld [vmem:[#allocation7 + $0x38] sm:$0xff] }
 0x263   :  { %1162 = vmatmul.mubr.msk.f32.gmra.mrb[4].mxu1 %vm247_vm1, %v226_v16 }
 0x264   :  { %1164 = vmatprep.mubr.msk.f32.mxu1 %vm247_vm1, %v228_v21 }
 0x267   :  { %1165 = vmatmul.mubr.msk.f32.gmra.mrb[6].mxu1 %vm247_vm1, %v230_v20 }
 0x32e   :  { %v1157_v40 = vpop.f32.mrb[0].mxu1 }
 0x32f   :  { %v386_v42 = vmul.f32 0.35355338, %v1157_v40  ;;  %v346_v43 = vpop.f32.mrb[1].mxu1 }
 0x330   :  { %v385_v45 = vmul.f32 0.35355338, %v346_v43 }
 0x331   :  { %v402_v46 = vadd.f32 %v394_v41, %v386_v42 }
 0x332   :  { %v1160_v47 = vpop.f32.mrb[2].mxu1  ;;  %v401_v48 = vadd.f32 %v393_v44, %v385_v45 }
 0x333   :  { %v388_v49 = vmul.f32 0.35355338, %v1160_v47  ;;  %v356_v50 = vpop.f32.mrb[3].mxu1  ;;  %v413_v51 = vsel %vm409_vm3, %v402_v46, -inf }
 0x334   :  { %v387_v53 = vmul.f32 0.35355338, %v356_v50  ;;  %414 = vmax.xlane.f32.xlu1 %v413_v51  ;;  %v410_v54 = vsel %vm409_vm3, %v401_v48, -inf }
 0x335   :  { %411 = vmax.xlane.f32.xlu0 %v410_v54  ;;  %v404_v59 = vadd.f32 %v396_v55, %v388_v49 }
 0x336   :  { %v1163_v56 = vpop.f32.mrb[4].mxu1  ;;  %v403_v57 = vadd.f32 %v395_v52, %v387_v53 }
 0x337   :  { %v366_v58 = vpop.f32.mrb[5].mxu1  ;;  %v390_v61 = vmul.f32 0.35355338, %v1163_v56  ;;  %v419_v6 = vsel %vm409_vm3, %v404_v59, -inf }
 0x338   :  { %v389_v62 = vmul.f32 0.35355338, %v366_v58  ;;  %v416_v63 = vsel %vm409_vm3, %v403_v57, -inf }
 0x339   :  { %417 = vmax.xlane.f32.xlu0 %v416_v63  ;;  %v406_v11 = vadd.f32 %v398_v0, %v390_v61 }
 0x33a   :  { %v1166_v1 = vpop.f32.mrb[6].mxu1  ;;  %v405_v2 = vadd.f32 %v397_v60, %v389_v62 }
 0x33b   :  { %v376_v3 = vpop.f32.mrb[7].mxu1  ;;  %v392_v8 = vmul.f32 0.35355338, %v1166_v1  ;;  %v425_v14 = vsel %vm409_vm3, %v406_v11, -inf }
 0x33c   :  { %v391_v9 = vmul.f32 0.35355338, %v376_v3  ;;  %v422_v10 = vsel %vm409_vm3, %v405_v2, -inf }
 0x33d   :  { %420 = vmax.xlane.f32.xlu0 %v419_v6  ;;  %423 = vmax.xlane.f32.xlu1 %v422_v10  ;;  %v408_v17 = vadd.f32 %v400_v12, %v392_v8 }
 0x33e   :  { %v407_v13 = vadd.f32 %v399_v4, %v391_v9 }
 0x33f   :  { %v431_v20 = vsel %vm409_vm3, %v408_v17, -inf }
 0x340   :  { %v428_v16 = vsel %vm409_vm3, %v407_v13, -inf }
 0x341   :  { %426 = vmax.xlane.f32.xlu0 %v425_v14  ;;  %429 = vmax.xlane.f32.xlu1 %v428_v16 }
 0x345   :  { %432 = vmax.xlane.f32.xlu0 %v431_v20 }
 0x352   :  { %1342 = vrot.lane.b32.xlu1 %v1759_v15, %s1577_s27 }
 0x3c1   :  { %v415_v21 = vpop.xlane.xlu1 %414 }
 0x3c2   :  { %v435_v23 = vsub.f32 %v402_v46, %v415_v21  ;;  %v412_v24 = vpop.xlane.xlu0 %411 }
 0x3c3   :  { %v434_v25 = vsub.f32 %v401_v48, %v412_v24 }
 0x3c4   :  { %v444_v26 = vmul.f32 1.442695, %v435_v23 }
 0x3c5   :  { %v442_v27 = vmul.f32 1.442695, %v434_v25 }
 0x3c6   :  { %1361 = vpow2.f32 %v444_v26  ;;  %v418_v28 = vpop.xlane.xlu0 %417 }
 0x3c7   :  { %1363 = vpow2.f32 %v442_v27  ;;  %v436_v29 = vsub.f32 %v403_v57, %v418_v28 }
 0x3c9   :  { %v446_v30 = vmul.f32 1.442695, %v436_v29 }
 0x3ca   :  { %v421_v31 = vpop.xlane.xlu0 %420  ;;  %v424_v32 = vpop.xlane.xlu1 %423 }
 0x3cb   :  { %1365 = vpow2.f32 %v446_v30  ;;  %v437_v33 = vsub.f32 %v404_v59, %v421_v31  ;;  %v438_v34 = vsub.f32 %v405_v2, %v424_v32 }
 0x3cd   :  { %v448_v35 = vmul.f32 1.442695, %v437_v33  ;;  %v450_v36 = vmul.f32 1.442695, %v438_v34 }
 0x3ce   :  { %v427_v37 = vpop.xlane.xlu0 %426  ;;  %v430_v15 = vpop.xlane.xlu1 %429 }
 0x3cf   :  { %1367 = vpow2.f32 %v448_v35  ;;  %v439_v38 = vsub.f32 %v406_v11, %v427_v37  ;;  %v440_v42 = vsub.f32 %v407_v13, %v430_v15 }
 0x3d0   :  { %v1810_v39 = vpop.eup %1361  ;;  %1369 = vpow2.f32 %v450_v36 }
 0x3d1   :  { %v1364_v40 = vpop.eup %1363  ;;  %v452_v41 = vmul.f32 1.442695, %v439_v38  ;;  %v461_v43 = vsel %vm409_vm3, %v1810_v39, 0.0  ;;  %v454_v51 = vmul.f32 1.442695, %v440_v42  ;;  %v693_v42 = vld [vmem:[#allocation8 + $0x10] sm:$0xff] }
 0x3d2   :  { %462 = vadd.xlane.f32.xlu0 %v461_v43  ;;  %v433_v44 = vpop.xlane.xlu0 %432  ;;  %v1343_v45 = vpop.permute.xlu1 %1342  ;;  %v458_v46 = vsel %vm409_vm3, %v1364_v40, 0.0  ;;  %v694_v43 = vld [vmem:[#allocation8 + $0x18] sm:$0xff] }
 0x3d3   :  { %1371 = vpow2.f32 %v452_v41  ;;  %v441_v47 = vsub.f32 %v408_v17, %v433_v44  ;;  %v1345_v48 = vunpack.i.h.bf16 %v1343_v45  ;;  %v1344_v49 = vunpack.i.l.bf16 %v1343_v45  ;;  %459 = vadd.xlane.f32.xlu1 %v458_v46 }
 0x3d4   :  { %v1269_v44 = vpack.c.bf16 %v694_v43, %v693_v42  ;;  %v859_v42 = vld [vmem:[#allocation10 + $0x10] sm:$0xff]  ;;  %v860_v43 = vld [vmem:[#allocation10 + $0x18] sm:$0xff] }
 0x3d5   :  { %v1815_v50 = vpop.eup %1365  ;;  %v456_v52 = vmul.f32 1.442695, %v441_v47  ;;  %v1249_v53 = vpack.c.bf16 %v1345_v48, %v1344_v49 }
 0x3d6   :  { %v464_v54 = vsel %vm409_vm3, %v1815_v50, 0.0 }
 0x3d7   :  { %1373 = vpow2.f32 %v456_v52  ;;  %465 = vadd.xlane.f32.xlu1 %v464_v54  ;;  %1250 = vmatprep.subr.bf16.mxu0 %v1249_v53 }
 0x3d8   :  { %1252 = vmatpush3.bf16.msra.mxu0 %v1249_v53  ;;  %1375 = vpow2.f32 %v454_v51 }
 0x3d9   :  { %v1819_v55 = vpop.eup %1367 }
 0x3da   :  { %v1821_v56 = vpop.eup %1369  ;;  %v467_v57 = vsel %vm409_vm3, %v1819_v55, 0.0 }
 0x3db   :  { %468 = vadd.xlane.f32.xlu0 %v467_v57  ;;  %v470_v58 = vsel %vm409_vm3, %v1821_v56, 0.0 }
 0x3dc   :  { %471 = vadd.xlane.f32.xlu1 %v470_v58 }
 0x3dd   :  { %v1827_v59 = vpop.eup %1371 }
 0x3de   :  { %v473_v60 = vsel %vm409_vm3, %v1827_v59, 0.0 }
 0x3df   :  { %474 = vadd.xlane.f32.xlu0 %v473_v60 }
 0x3e1   :  { %v1831_v61 = vpop.eup %1373 }
 0x3e2   :  { %v479_v62 = vsel %vm409_vm3, %v1831_v61, 0.0  ;;  %v1376_v63 = vpop.eup %1375 }
 0x3e3   :  { %480 = vadd.xlane.f32.xlu0 %v479_v62  ;;  %v476_v0 = vsel %vm409_vm3, %v1376_v63, 0.0 }
 0x3e7   :  { %477 = vadd.xlane.f32.xlu0 %v476_v0 }
 0x3ed   :  { %1352 = vrot.lane.b32.xlu1 %v1762_v18, %s1577_s27 }
 0x3f1   :  { %1357 = vrot.lane.b32.xlu1 %v1768_v22, %s1577_s27 }
 0x3fd   :  { %1347 = vrot.lane.b32.xlu0 %v1764_v19, %s1577_s27 }
 0x45f   :  { %v463_v2 = vpop.xlane.xlu0 %462 }
 0x460   :  { %v460_v1 = vpop.xlane.xlu1 %459 }
 0x461   :  { %1377 = vrcp.f32 %v460_v1  ;;  %v1072_v1 = vld [vmem:[%s1934_s5] ss:$0 sm:$0xff] }
 0x462   :  { %1379 = vrcp.f32 %v463_v2 }
 0x464   :  { %v466_v3 = vpop.xlane.xlu1 %465 }
 0x465   :  { %1381 = vrcp.f32 %v466_v3 }
 0x468   :  { %v469_v4 = vpop.xlane.xlu0 %468 }
 0x469   :  { %v472_v10 = vpop.xlane.xlu1 %471  ;;  %1383 = vrcp.f32 %v469_v4 }
 0x46a   :  { %1385 = vrcp.f32 %v472_v10 }
 0x46b   :  { %v1378_v6 = vpop.eup %1377 }
 0x46c   :  { %v475_v8 = vpop.xlane.xlu0 %474  ;;  %v498_v9 = vmul.f32 %v1378_v6, %v1364_v40  ;;  %v1380_v26 = vpop.eup %1379  ;;  %v692_v40 = vld [vmem:[#allocation8 + $0x8] sm:$0xff] }
 0x46d   :  { %v1353_v12 = vpop.permute.xlu1 %1352  ;;  %1387 = vrcp.f32 %v475_v8  ;;  %v499_v28 = vmul.f32 %v1380_v26, %v1810_v39  ;;  %v691_v39 = vld [vmem:[#allocation8] sm:$0xff] }
 0x46e   :  { %1183 = vmatprep.mubr.msk.f32.mxu0 %vm409_vm3, %v498_v9  ;;  %v1355_v14 = vunpack.i.h.bf16 %v1353_v12  ;;  %v1354_v22 = vunpack.i.l.bf16 %v1353_v12  ;;  %v1265_v41 = vpack.c.bf16 %v692_v40, %v691_v39 }
 0x46f   :  { %v1382_v27 = vpop.eup %1381 }
 0x470   :  { %v481_v11 = vpop.xlane.xlu0 %480  ;;  %v1257_v21 = vpack.c.bf16 %v1355_v14, %v1354_v22  ;;  %v500_v30 = vmul.f32 %v1382_v27, %v1815_v50 }
 0x471   :  { %v1358_v19 = vpop.permute.xlu1 %1357 }
 0x472   :  { %v1360_v23 = vunpack.i.h.bf16 %v1358_v19  ;;  %v1359_v24 = vunpack.i.l.bf16 %v1358_v19 }
 0x473   :  { %v1384_v29 = vpop.eup %1383 }
 0x474   :  { %v478_v18 = vpop.xlane.xlu0 %477  ;;  %v1261_v25 = vpack.c.bf16 %v1360_v23, %v1359_v24  ;;  %v1386_v31 = vpop.eup %1385  ;;  %v501_v32 = vmul.f32 %v1384_v29, %v1819_v55 }
 0x475   :  { %1389 = vrcp.f32 %v478_v18  ;;  %v502_v34 = vmul.f32 %v1386_v31, %v1821_v56 }
 0x476   :  { %1391 = vrcp.f32 %v481_v11 }
 0x477   :  { %v1388_v33 = vpop.eup %1387 }
 0x478   :  { %v1348_v13 = vpop.permute.xlu0 %1347  ;;  %v503_v36 = vmul.f32 %v1388_v33, %v1827_v59 }
 0x479   :  { %v1350_v16 = vunpack.i.h.bf16 %v1348_v13  ;;  %v1349_v17 = vunpack.i.l.bf16 %v1348_v13 }
 0x47b   :  { %v1253_v20 = vpack.c.bf16 %v1350_v16, %v1349_v17 }
 0x47d   :  { %1254 = vmatprep.subr.bf16.mxu0 %v1253_v20 }
 0x47e   :  { %1256 = vmatpush3.bf16.msra.mxu0 %v1253_v20 }
 0x47f   :  { %1258 = vmatprep.subr.bf16.mxu0 %v1257_v21  ;;  %v1390_v35 = vpop.eup %1389 }
 0x480   :  { %v1392_v37 = vpop.eup %1391  ;;  %v504_v15 = vmul.f32 %v1390_v35, %v1376_v63 }
 0x481   :  { %v505_v38 = vmul.f32 %v1392_v37, %v1831_v61 }
 0x482   :  { %1260 = vmatpush3.bf16.msra.mxu0 %v1257_v21 }
 0x483   :  { %1262 = vmatprep.subr.bf16.mxu0 %v1261_v25 }
 0x486   :  { %1264 = vmatpush3.bf16.msra.mxu0 %v1261_v25 }
 0x487   :  { %1266 = vmatprep.subr.bf16.mxu0 %v1265_v41 }
 0x489   :  { %1184 = vmatmul.mubr.msk.f32.vlgmr.msra.gmra.mrb[2].mxu0 %vm409_vm3, %v499_v28 }
 0x48a   :  { %1186 = vmatprep.mubr.msk.f32.mxu0 %vm409_vm3, %v500_v30  ;;  %1268 = vmatpush3.bf16.msra.mxu0 %v1265_v41 }
 0x48b   :  { %1270 = vmatprep.subr.bf16.mxu0 %v1269_v44 }
 0x48d   :  { %1187 = vmatmul.mubr.msk.f32.gmra.mrb[4].mxu0 %vm409_vm3, %v501_v32 }
 0x48e   :  { %1189 = vmatprep.mubr.msk.f32.mxu0 %vm409_vm3, %v502_v34  ;;  %1272 = vmatpush3.bf16.msra.mxu0 %v1269_v44 }
 0x491   :  { %1190 = vmatmul.mubr.msk.f32.gmra.mrb[6].mxu0 %vm409_vm3, %v503_v36 }
 0x492   :  { %1192 = vmatprep.mubr.msk.f32.mxu0 %vm409_vm3, %v504_v15  ;;  %v857_v15 = vld [vmem:[#allocation10] sm:$0xff] }
 0x495   :  { %1193 = vmatmul.mubr.msk.f32.gmra.mrb[8].mxu0 %vm409_vm3, %v505_v38  ;;  %v858_v38 = vld [vmem:[#allocation10 + $0x8] sm:$0xff] }
 0x496   :  { %v1273_v40 = vpack.c.bf16 %v858_v38, %v857_v15 }
 0x498   :  { %1274 = vmatprep.subr.bf16.mxu0 %v1273_v40 }
 0x55c   :  { %v1185_v45 = vpop.f32.mrb[2].mxu0 }
 0x55d   :  { %660 = vrot.lane.b32.xlu1 %v1185_v45, %s1568_s16  ;;  %v620_v46 = vpop.f32.mrb[3].mxu0  ;;  %v1277_v45 = vpack.c.bf16 %v860_v43, %v859_v42 }
 0x560   :  { %v1188_v47 = vpop.f32.mrb[4].mxu0 }
 0x561   :  { %668 = vrot.lane.b32.xlu1 %v1188_v47, %s1578_s28  ;;  %v630_v48 = vpop.f32.mrb[5].mxu0 }
 0x564   :  { %v1191_v49 = vpop.f32.mrb[6].mxu0 }
 0x565   :  { %664 = vrot.lane.b32.xlu1 %v630_v48, %s1579_s1  ;;  %677 = vrot.lane.b32.xlu0 %v1191_v49, %s1568_s16  ;;  %v640_v50 = vpop.f32.mrb[7].mxu0 }
 0x568   :  { %v1194_v51 = vpop.f32.mrb[8].mxu0 }
 0x569   :  { %685 = vrot.lane.b32.xlu1 %v1194_v51, %s1578_s28  ;;  %v650_v52 = vpop.f32.mrb[9].mxu0 }
 0x56a   :  { %681 = vrot.lane.b32.xlu0 %v650_v52, %s1579_s1  ;;  %v785_v52 = vld [vmem:[%s1935_s6] sm:$0xff] }
 0x5cf   :  { %v661_v53 = vpop.permute.xlu1 %660 }
 0x5d0   :  { %v671_v55 = vsel %vm247_vm1, %v620_v46, %v661_v53 }
 0x5d3   :  { %v669_v54 = vpop.permute.xlu1 %668 }
 0x5d7   :  { %v665_v56 = vpop.permute.xlu1 %664  ;;  %v678_v57 = vpop.permute.xlu0 %677 }
 0x5d8   :  { %v673_v58 = vsel %vm672_vm4, %v671_v55, %v665_v56  ;;  %v688_v60 = vsel %vm247_vm1, %v640_v50, %v678_v57  ;;  %v786_v55 = vld [vmem:[%s1936_s7] sm:$0xff] }
 0x5d9   :  { %v675_v59 = vsel %vm674_vm5, %v673_v58, %v669_v54 }
 0x5da   :  { %1203 = vmatprep.mubr.msk.f32.mxu0 %vm135_vm0, %v675_v59 }
 0x5db   :  { %v686_v62 = vpop.permute.xlu1 %685 }
 0x5dc   :  { %v682_v61 = vpop.permute.xlu0 %681 }
 0x5dd   :  { %v689_v63 = vsel %vm672_vm4, %v688_v60, %v682_v61 }
 0x5de   :  { %v690_v0 = vsel %vm674_vm5, %v689_v63, %v686_v62 }
 0x5df   :  { %1204 = vmatmul.mubr.msk.f32.vlgmr.msra.gmra.mrb[10].mxu0 %vm135_vm0, %v690_v0 }
 0x5e0   :  { %1276 = vmatpush3.bf16.msra.mxu0 %v1273_v40 }
 0x5e1   :  { %1278 = vmatprep.subr.bf16.mxu0 %v1277_v45 }
 0x5e4   :  { %1280 = vmatpush3.bf16.msra.mxu0 %v1277_v45 }
 0x6b2   :  { %v1205_v2 = vpop.f32.mrb[10].mxu0 }
 0x6b3   :  { %v774_v3 = vpop.f32.mrb[11].mxu0  ;;  %v780_v4 = vadd.f32 %v1205_v2, %v1072_v1  ;;  %v1075_v2 = vld [vmem:[#allocation11] ss:$0 sm:$0xff] }
 0x6b4   :  { %v775_v6 = vadd.f32 %v1072_v1, %v774_v3 }
 0x6b5   :  { %v1869_v9 = vadd.f32 %v780_v4, %v1751_v7 }
 0x6b6   :  { %v1866_v8 = vadd.f32 %v775_v6, %v1747_v5 }
 0x6b7   :  { %v822_v18 = vsel %vm135_vm0, %v1869_v9, 0.0  ;;  %v833_v5 = vmul.f32 %v1869_v9, %v1869_v9 }
 0x6b8   :  { %v787_v10 = vsel %vm135_vm0, %v1866_v8, 0.0  ;;  %v798_v11 = vmul.f32 %v1866_v8, %v1866_v8 }
 0x6b9   :  { %788 = vadd.xlane.f32.xlu0 %v787_v10  ;;  %v834_v7 = vsel %vm135_vm0, %v833_v5, 0.0 }
 0x6ba   :  { %v799_v12 = vsel %vm135_vm0, %v798_v11, 0.0 }
 0x6bb   :  { %800 = vadd.xlane.f32.xlu1 %v799_v12 }
 0x6bd   :  { %823 = vadd.xlane.f32.xlu0 %v822_v18 }
 0x6c1   :  { %835 = vadd.xlane.f32.xlu0 %v834_v7 }
 0x746   :  { %v789_v13 = vpop.xlane.xlu0 %788 }
 0x747   :  { %v790_v14 = vrot.slane %v789_v13, 4 }
 0x748   :  { %v801_v22 = vpop.xlane.xlu1 %800 }
 0x749   :  { %v791_v16 = vadd.f32 %v790_v14, %v789_v13  ;;  %v802_v17 = vrot.slane %v801_v22, 4 }
 0x74a   :  { %v824_v29 = vpop.xlane.xlu0 %823 }
 0x74b   :  { %v792_v19 = vrot.slane %v791_v16, 2  ;;  %v803_v20 = vadd.f32 %v802_v17, %v801_v22  ;;  %v825_v31 = vrot.slane %v824_v29, 4 }
 0x74d   :  { %v804_v21 = vrot.slane %v803_v20, 2  ;;  %v793_v23 = vadd.f32 %v792_v19, %v791_v16  ;;  %v826_v33 = vadd.f32 %v825_v31, %v824_v29 }
 0x74e   :  { %v836_v30 = vpop.xlane.xlu0 %835 }
 0x74f   :  { %v794_v24 = vrot.slane %v793_v23, 1  ;;  %v805_v25 = vadd.f32 %v804_v21, %v803_v20  ;;  %v837_v32 = vrot.slane %v836_v30, 4  ;;  %v827_v35 = vrot.slane %v826_v33, 2 }
 0x751   :  { %v795_v26 = vadd.f32 %v794_v24, %v793_v23  ;;  %v806_v27 = vrot.slane %v805_v25, 1  ;;  %v838_v34 = vadd.f32 %v837_v32, %v836_v30  ;;  %v828_v39 = vadd.f32 %v827_v35, %v826_v33 }
 0x753   :  { %1281 = vpush %v795_v26  ;;  %v807_v28 = vadd.f32 %v806_v27, %v805_v25  ;;  %v839_v36 = vrot.slane %v838_v34, 2  ;;  %v829_v44 = vrot.slane %v828_v39, 1 }
 0x755   :  { %1283 = vpush %v807_v28  ;;  %v840_v41 = vadd.f32 %v839_v36, %v838_v34  ;;  %v830_v48 = vadd.f32 %v829_v44, %v828_v39 }
 0x757   :  { %v841_v46 = vrot.slane %v840_v41, 1 }
 0x759   :  { %v842_v49 = vadd.f32 %v841_v46, %v840_v41 }
 0x784   :  { %s1282_s5 = spop %1281 }
 0x785   :  { %s1881_s22 = smul.f32 0.00390625, %s1282_s5 }
 0x786   :  { %s1284_s29 = spop %1283 }
 0x787   :  { %s810_s13 = smul.f32 %s1881_s22, %s1881_s22  ;;  %v812_v50 = vstv %s1881_s22 }
 0x788   :  { %s809_s17 = smul.f32 0.00390625, %s1284_s29  ;;  %v813_v51 = vsub.f32 %v1866_v8, %v812_v50  ;;  %v952_v50 = vld [vmem:[%s1940_s11] sm:$0xff]  ;;  %s1030_s11 = sshll.u32 %s1580_s9, 4  ;;  %s1031_s11 = int_to_ptr.vmem [resolvable:$true] %s1030_s11 }
 0x789   :  { %s1533_s23 = scalar_lea.vmem %s1031_s11, 256  ;;  %p1538_p7 = scmp.lt.s32.totalorder %s1031_s11, %s1031_s11 }
 0x78a   :  { %s811_s18 = ssub.f32 %s809_s17, %s810_s13  ;;  %p1534_p6 = scmp.ne.s32.totalorder %s1031_s11, %s1533_s23 }
 0x78b   :  { %p1539_p8 = scmp.lt.s32.totalorder %s1533_s23, %s1533_s23 }
 0x78c   :  { %s814_s0 = sadd.f32 1e-05, %s811_s18 }
 0x78d   :  { %p1540_p9 = por %p1539_p8, %p1538_p7 }
 0x78e   :  { %v815_v37 = vstv %s814_s0 }
 0x78f   :  { %1393 = vrsqrt.f32 %v815_v37  ;;  %p1541_p10 = pnand %p1540_p9, %p1534_p6 }
 0x799   :  { %v1394_v47 = vpop.eup %1393 }
 0x79a   :  { %1285 = vpush %v1394_v47  ;;  %v951_v47 = vld [vmem:[%s1939_s10] sm:$0xff] }
 0x79b   :  { %1287 = vpush %v830_v48 }
 0x79c   :  { %1289 = vpush %v842_v49 }
 0x7cb   :  { %s1286_s30 = spop %1285 }
 0x7cc   :  { %v818_v53 = vstv %s1286_s30  ;;  %s1288_s25 = spop %1287 }
 0x7cd   :  { %v819_v54 = vmul.f32 %v818_v53, %v813_v51  ;;  %s832_s8 = smul.f32 0.00390625, %s1288_s25  ;;  %s1290_s20 = spop %1289 }
 0x7ce   :  { %s844_s4 = smul.f32 0.00390625, %s1290_s20 }
 0x7cf   :  { %v820_v56 = vmul.f32 %v819_v54, %v785_v52  ;;  %s845_s24 = smul.f32 %s832_s8, %s832_s8  ;;  %v847_v60 = vstv %s832_s8 }
 0x7d0   :  { %v848_v61 = vsub.f32 %v1869_v9, %v847_v60 }
 0x7d1   :  { %v821_v57 = vadd.f32 %v820_v56, %v786_v55  ;;  %s846_s26 = ssub.f32 %s844_s4, %s845_s24 }
 0x7d3   :  { %s849_s2 = sadd.f32 1e-05, %s846_s26  ;;  %1214 = vmatprep.mubr.msk.f32.mxu0 %vm135_vm0, %v821_v57 }
 0x7d5   :  { %v850_v58 = vstv %s849_s2 }
 0x7d6   :  { %1395 = vrsqrt.f32 %v850_v58 }
 0x7e0   :  { %v1396_v59 = vpop.eup %1395 }
 0x7e1   :  { %1291 = vpush %v1396_v59 }
 0x812   :  { %s1292_s6 = spop %1291 }
 0x813   :  { %v853_v62 = vstv %s1292_s6 }
 0x814   :  { %v854_v63 = vmul.f32 %v853_v62, %v848_v61 }
 0x816   :  { %v855_v0 = vmul.f32 %v854_v63, %v785_v52 }
 0x818   :  { %v856_v1 = vadd.f32 %v855_v0, %v786_v55 }
 0x81a   :  { %1215 = vmatmul.mubr.msk.f32.vlgmr.msra.gmra.mrb[12].mxu0 %vm135_vm0, %v856_v1 }
 0x8ed   :  { %v1216_v3 = vpop.f32.mrb[12].mxu0 }
 0x8ee   :  { %v946_v4 = vadd.f32 %v1216_v3, %v1075_v2  ;;  %v940_v6 = vpop.f32.mrb[13].mxu0 }
 0x8ef   :  { %v941_v8 = vadd.f32 %v1075_v2, %v940_v6 }
 0x8f0   :  { %v1896_v10 = vadd.f32 %v946_v4, %v856_v1 }
 0x8f1   :  { %v949_v11 = vadd.f32 %v941_v8, %v821_v57 }
 0x8f2   :  { %v999_v5 = vmul.f32 %v1896_v10, %v1896_v10  ;;  %v988_v7 = vsel %vm135_vm0, %v1896_v10, 0.0 }
 0x8f3   :  { %v953_v12 = vsel %vm135_vm0, %v949_v11, 0.0  ;;  %v964_v18 = vmul.f32 %v949_v11, %v949_v11 }
 0x8f4   :  { %954 = vadd.xlane.f32.xlu1 %v953_v12  ;;  %v1000_v13 = vsel %vm135_vm0, %v999_v5, 0.0 }
 0x8f5   :  { %v965_v9 = vsel %vm135_vm0, %v964_v18, 0.0 }
 0x8f6   :  { %966 = vadd.xlane.f32.xlu0 %v965_v9 }
 0x8f8   :  { %989 = vadd.xlane.f32.xlu1 %v988_v7 }
 0x8fa   :  { %1001 = vadd.xlane.f32.xlu0 %v1000_v13 }
 0x981   :  { %v955_v14 = vpop.xlane.xlu1 %954 }
 0x982   :  { %v956_v22 = vrot.slane %v955_v14, 4 }
 0x983   :  { %v967_v16 = vpop.xlane.xlu0 %966 }
 0x984   :  { %v957_v17 = vadd.f32 %v956_v22, %v955_v14  ;;  %v968_v19 = vrot.slane %v967_v16, 4 }
 0x985   :  { %v990_v30 = vpop.xlane.xlu1 %989 }
 0x986   :  { %v958_v20 = vrot.slane %v957_v17, 2  ;;  %v969_v21 = vadd.f32 %v968_v19, %v967_v16  ;;  %v991_v32 = vrot.slane %v990_v30, 4 }
 0x987   :  { %v1002_v31 = vpop.xlane.xlu0 %1001 }
 0x988   :  { %v970_v23 = vrot.slane %v969_v21, 2  ;;  %v959_v24 = vadd.f32 %v958_v20, %v957_v17  ;;  %v1003_v33 = vrot.slane %v1002_v31, 4  ;;  %v992_v34 = vadd.f32 %v991_v32, %v990_v30 }
 0x98a   :  { %v960_v25 = vrot.slane %v959_v24, 1  ;;  %v971_v26 = vadd.f32 %v970_v23, %v969_v21  ;;  %v1004_v35 = vadd.f32 %v1003_v33, %v1002_v31  ;;  %v993_v36 = vrot.slane %v992_v34, 2 }
 0x98c   :  { %v961_v27 = vadd.f32 %v960_v25, %v959_v24  ;;  %v972_v28 = vrot.slane %v971_v26, 1  ;;  %v1005_v37 = vrot.slane %v1004_v35, 2  ;;  %v994_v38 = vadd.f32 %v993_v36, %v992_v34 }
 0x98e   :  { %1293 = vpush %v961_v27  ;;  %v973_v29 = vadd.f32 %v972_v28, %v971_v26  ;;  %v1006_v39 = vadd.f32 %v1005_v37, %v1004_v35  ;;  %v995_v40 = vrot.slane %v994_v38, 1 }
 0x990   :  { %1295 = vpush %v973_v29  ;;  %v1007_v41 = vrot.slane %v1006_v39, 1  ;;  %v996_v43 = vadd.f32 %v995_v40, %v994_v38 }
 0x992   :  { %v1008_v44 = vadd.f32 %v1007_v41, %v1006_v39 }
 0x9bf   :  { %s1294_s7 = spop %1293 }
 0x9c0   :  { %s963_s27 = smul.f32 0.00390625, %s1294_s7 }
 0x9c1   :  { %s1296_s28 = spop %1295 }
 0x9c2   :  { %s976_s1 = smul.f32 %s963_s27, %s963_s27  ;;  %v978_v45 = vstv %s963_s27 }
 0x9c3   :  { %s975_s3 = smul.f32 0.00390625, %s1296_s28  ;;  %v979_v46 = vsub.f32 %v949_v11, %v978_v45 }
 0x9c5   :  { %s977_s14 = ssub.f32 %s975_s3, %s976_s1 }
 0x9c7   :  { %s980_s5 = sadd.f32 1e-05, %s977_s14 }
 0x9c9   :  { %v981_v15 = vstv %s980_s5 }
 0x9ca   :  { %1397 = vrsqrt.f32 %v981_v15 }
 0x9d4   :  { %v1398_v42 = vpop.eup %1397 }
 0x9d5   :  { %1297 = vpush %v1398_v42 }
 0x9d6   :  { %1299 = vpush %v996_v43 }
 0x9d7   :  { %1301 = vpush %v1008_v44 }
 0xa06   :  { %s1298_s22 = spop %1297 }
 0xa07   :  { %v984_v48 = vstv %s1298_s22  ;;  %s1300_s17 = spop %1299 }
 0xa08   :  { %v985_v49 = vmul.f32 %v984_v48, %v979_v46  ;;  %s998_s18 = smul.f32 0.00390625, %s1300_s17  ;;  %s1302_s0 = spop %1301 }
 0xa09   :  { %s1010_s21 = smul.f32 0.00390625, %s1302_s0 }
 0xa0a   :  { %v986_v51 = vmul.f32 %v985_v49, %v951_v47  ;;  %s1011_s25 = smul.f32 %s998_s18, %s998_s18  ;;  %v1013_v55 = vstv %s998_s18 }
 0xa0b   :  { %v1014_v56 = vsub.f32 %v1896_v10, %v1013_v55 }
 0xa0c   :  { %v987_v52 = vadd.f32 %v986_v51, %v952_v50  ;;  %s1012_s8 = ssub.f32 %s1010_s21, %s1011_s25 }
 0xa0e   :  { %1023 = vst.msk [vmem:[#allocation13] sm:$0xff] %vm135_vm0, %v987_v52  ;;  %s1015_s20 = sadd.f32 1e-05, %s1012_s8 }
 0xa10   :  { %v1016_v53 = vstv %s1015_s20 }
 0xa11   :  { %1399 = vrsqrt.f32 %v1016_v53 }
 0xa1b   :  { %v1400_v54 = vpop.eup %1399 }
 0xa1c   :  { %1303 = vpush %v1400_v54 }
 0xa4d   :  { %s1304_s10 = spop %1303 }
 0xa4e   :  { %v1019_v57 = vstv %s1304_s10 }
 0xa4f   :  { %v1020_v58 = vmul.f32 %v1019_v57, %v1014_v56 }
 0xa51   :  { %v1021_v59 = vmul.f32 %v1020_v58, %v951_v47 }
 0xa53   :  { %v1022_v60 = vadd.f32 %v1021_v59, %v952_v50 }
 0xa55   :  { %1024 = vst.msk [vmem:[#allocation13 + $0x8] sm:$0xff] %vm135_vm0, %v1022_v60 }
 0xa56   :  { %1544 = shalt.err (!%p1541_p10)
}
 0xa57   :  { %s1545_s26 = scalar_lea.hbm %s1941_s12, 256 }
 0xa58   :  { %p1546_p11 = scmp.ne.s32.totalorder %s1941_s12, %s1545_s26  ;;  %p1549_p12 = scmp.lt.u32.totalorder %s1545_s26, %s1941_s12 }
 0xa5a   :  { %p1551_p13 = pnand %p1549_p12, %p1546_p11 }
 0xa5c   :  { %1554 = shalt.err (!%p1551_p13)
}
 0xa5d   :  { %1036 = dma.vmem_to_hbm [thread:$0]  %s1031_s11, 256, %s1941_s12, [#allocation4], %s1567_s15, %s1567_s15, %s1568_s16  }
 0xa5e   :  { %1563 = dma.done.wait [#allocation4], 256  }
 0xa5f   :  { %1564 = vsyncadd [#allocation4], 4294967040 }
 0xa60   :  { %1040 = vsyncpa [#allocation3], 1 }
 0xa61   :  { %1041 = vsyncpa [#allocation6], 1 }
 0xa62   :  { %1042 = vsyncpa [#allocation9], 1 }
 0xa63   :  { %1043 = vsyncpa [#allocation12], 1 }
 0xa64   :  { %1044 = vsyncpa [#allocation4], 1 }

</bundles_post_ra>
